<compile_context>
chip_gen: v7x
topology: tpu7x:2x2x1
jax: 0.10.0
libtpu: 0.0.40
codegen_flags: <defaults>
</compile_context>

<pallas_src>
import functools

import jax
import jax.numpy as jnp
from jax.experimental import pallas as pl
from jax.experimental.pallas import tpu as pltpu


# ----------------------------------------------------------------------------
# Fused kernel: one grid step == one encoder layer applied to one batch
# element's (S, D) activation slab, held resident in VMEM scratch across the
# layer axis.
# ----------------------------------------------------------------------------
def fused_encoder_kernel(x_ref, wqkv_ref, bqkv_ref, wo_ref, bo_ref,
                         w1_ref, b1_ref, w2_ref, b2_ref,
                         g1_ref, be1_ref, g2_ref, be2_ref,
                         o_ref, xs_ref, *, nhead):
    layer = pl.program_id(1)

    # Load this batch element's input into the resident scratch at layer 0
    # (also re-initializes the carry at every batch-chunk boundary).
    @pl.when(layer == 0)
    def _():
        xs_ref[...] = x_ref[0].astype(jnp.float32)

    x = xs_ref[...]                               # (S, D) f32
    S, D = x.shape
    hd = D // nhead

    # This layer's weights (pre-transposed + bf16-cast in the wrapper).
    wqkv = wqkv_ref[0]                            # (D, 3D) bf16, Q cols pre-scaled
    bqkv = bqkv_ref[0]                            # (1, 3D) f32, Q part pre-scaled
    wo = wo_ref[0]                                # (D, D)  bf16
    bo = bo_ref[0]                                # (1, D)  f32
    w1 = w1_ref[0]                                # (D, FF) bf16
    b1 = b1_ref[0]                                # (1, FF) f32
    w2 = w2_ref[0]                                # (FF, D) bf16
    b2 = b2_ref[0]                                # (1, D)  f32

    # ---- self attention ------------------------------------------------------
    qkv = jnp.dot(x.astype(jnp.bfloat16), wqkv,
                  preferred_element_type=jnp.float32) + bqkv          # (S, 3D)

    # Per-head softmax is inherent; head extraction is a static lane slice
    # (same data movement a head-major reshape would need).  The expensive
    # per-head K=hd output projections are gone: heads are concatenated once
    # and hit a single K=D projection below.
    head_outs = []
    for h in range(nhead):                        # nhead is small & static
        qh = qkv[:, h * hd:(h + 1) * hd].astype(jnp.bfloat16)         # (S, hd)
        kh = qkv[:, D + h * hd:D + (h + 1) * hd].astype(jnp.bfloat16)
        vh = qkv[:, 2 * D + h * hd:2 * D + (h + 1) * hd].astype(jnp.bfloat16)
        # scores = q @ k^T without an explicit transpose (contract last dims)
        s = jax.lax.dot_general(qh, kh, (((1,), (1,)), ((), ())),
                                preferred_element_type=jnp.float32)   # (S, S)
        s = s - jnp.max(s, axis=-1, keepdims=True)
        p = jnp.exp(s)
        denom = jnp.sum(p, axis=-1, keepdims=True)                    # (S, 1)
        pv = jnp.dot(p.astype(jnp.bfloat16), vh,
                     preferred_element_type=jnp.float32)              # (S, hd)
        head_outs.append(pv / denom)              # exact softmax normalization
    o = jnp.concatenate(head_outs, axis=-1)                           # (S, D)

    attn = jnp.dot(o.astype(jnp.bfloat16), wo,
                   preferred_element_type=jnp.float32) + bo           # (S, D)

    # ---- residual + LayerNorm 1 (f32) ----------------------------------------
    y = x + attn
    mu = jnp.mean(y, axis=-1, keepdims=True)
    var = jnp.mean((y - mu) ** 2, axis=-1, keepdims=True)
    y = (y - mu) * jax.lax.rsqrt(var + 1e-5) * g1_ref[0] + be1_ref[0]

    # ---- feed-forward (ReLU; dropout = identity at inference) ----------------
    h1 = jnp.maximum(jnp.dot(y.astype(jnp.bfloat16), w1,
                             preferred_element_type=jnp.float32) + b1, 0.0)
    ff = jnp.dot(h1.astype(jnp.bfloat16), w2,
                 preferred_element_type=jnp.float32) + b2

    # ---- residual + LayerNorm 2 (f32) ----------------------------------------
    z = y + ff
    mu = jnp.mean(z, axis=-1, keepdims=True)
    var = jnp.mean((z - mu) ** 2, axis=-1, keepdims=True)
    z = (z - mu) * jax.lax.rsqrt(var + 1e-5) * g2_ref[0] + be2_ref[0]

    xs_ref[...] = z                               # carry to the next layer

    # Write the output block only once, on the last layer.
    @pl.when(layer == pl.num_programs(1) - 1)
    def _():
        o_ref[0] = z.astype(o_ref.dtype)


def _vmem_limit_bytes(S, D, FF):
    act = S * D * 4                                    # resident f32 carry
    io = 2 * 2 * S * D * 4                             # in + out blocks (dbl-buf)
    w = 2 * (3 * D * D + D * D + D * FF + FF * D)      # bf16 matmul weights
    w += 4 * (3 * D + 2 * D + FF + 4 * D)              # f32 biases + LN params
    w *= 2                                             # double-buffered pipeline
    tmp = S * (3 * D + 3 * D + FF) * 4                 # qkv / attn / h1 / y / z
    est = act + io + w + tmp
    # Headroom, but never below the scoped default and never above v7x physical.
    return int(min(max(2 * est, 32 * 1024 * 1024), 64 * 1024 * 1024))


# ----------------------------------------------------------------------------
# BinocularformerEncoder forward: embedding glue in plain JAX, all encoder
# layers in one fused pallas_call.
# EmbedType: START=0 (padding_idx -> zero vector), PATCH=1, END=2, CLS=3
# ----------------------------------------------------------------------------
def binocularformer_encoder(x, embedding, layer_params, nhead):
    bs, seq_len, D = x.shape
    S = seq_len + 3
    L = len(layer_params)
    FF = layer_params[0]["w1"].shape[0]
    hd = D // nhead

    # --- embedding tokens (plain JAX glue) ---
    start = jnp.broadcast_to(embedding[0], (bs, 1, D))   # zeros (padding_idx=0)
    end = jnp.broadcast_to(embedding[2], (bs, 1, D))
    cls = jnp.broadcast_to(embedding[3], (bs, 1, D))
    x = x + embedding[1]                                 # PATCH embedding broadcast
    x = jnp.concatenate([start, x, end, cls], axis=1)    # (bs, S, D)

    # --- stack per-layer weights; fold 1/sqrt(hd) into Q; pre-transpose;
    #     stream matmul weights in bf16 (biases / LN params stay f32) ---
    def stack(key):
        return jnp.stack([p[key] for p in layer_params])

    scale = 1.0 / (hd ** 0.5)
    wqkv = stack("wqkv").at[:, :D, :].multiply(scale)          # (L, 3D, D)
    bqkv = stack("bqkv").at[:, :, :D].multiply(scale)          # (L, 1, 3D)
    wqkv_t = jnp.transpose(wqkv, (0, 2, 1)).astype(jnp.bfloat16)       # (L, D, 3D)
    wo_t = jnp.transpose(stack("wo"), (0, 2, 1)).astype(jnp.bfloat16)  # (L, D, D)
    w1_t = jnp.transpose(stack("w1"), (0, 2, 1)).astype(jnp.bfloat16)  # (L, D, FF)
    w2_t = jnp.transpose(stack("w2"), (0, 2, 1)).astype(jnp.bfloat16)  # (L, FF, D)
    bo, b1, b2 = stack("bo"), stack("b1"), stack("b2")
    g1, be1, g2, be2 = stack("g1"), stack("be1"), stack("g2"), stack("be2")

    def wspec(*shape):
        n = len(shape)
        return pl.BlockSpec((1,) + shape, lambda c, l, _n=n: (l,) + (0,) * _n)

    x_spec = pl.BlockSpec((1, S, D), lambda c, l: (c, 0, 0))

    kern = functools.partial(fused_encoder_kernel, nhead=nhead)
    out = pl.pallas_call(
        kern,
        out_shape=jax.ShapeDtypeStruct((bs, S, D), x.dtype),
        grid=(bs, L),                       # batch chunks (parallel), layers (carry)
        in_specs=[
            x_spec,                                     # x (one batch element)
            wspec(D, 3 * D), wspec(1, 3 * D),           # in_proj weight.T / bias
            wspec(D, D), wspec(1, D),                   # out_proj weight.T / bias
            wspec(D, FF), wspec(1, FF),                 # linear1 weight.T / bias
            wspec(FF, D), wspec(1, D),                  # linear2 weight.T / bias
            wspec(1, D), wspec(1, D),                   # norm1 gamma / beta
            wspec(1, D), wspec(1, D),                   # norm2 gamma / beta
        ],
        out_specs=x_spec,
        scratch_shapes=[pltpu.VMEM((S, D), jnp.float32)],   # layer-to-layer carry
        compiler_params=pltpu.CompilerParams(
            dimension_semantics=("parallel", "arbitrary"),
            vmem_limit_bytes=_vmem_limit_bytes(S, D, FF)),
    )(x, wqkv_t, bqkv, wo_t, bo, w1_t, b1, w2_t, b2, g1, be1, g2, be2)
    return out


# ----------------------------------------------------------------------------
# Pure-JAX (f32) reference for correctness check
# ----------------------------------------------------------------------------
def ref_layer(x, p, nhead):
    bs, S, D = x.shape
    hd = D // nhead
    qkv = jnp.einsum("bsd,ed->bse", x, p["wqkv"]) + p["bqkv"][0]
    q, k, v = qkv[..., :D], qkv[..., D:2 * D], qkv[..., 2 * D:]

    def split(t):
        return t.reshape(bs, S, nhead, hd).transpose(0, 2, 1, 3)

    q, k, v = split(q) / (hd ** 0.5), split(k), split(v)
    s = jnp.einsum("bhqd,bhkd->bhqk", q, k)
    pw = jax.nn.softmax(s, axis=-1)
    o = jnp.einsum("bhqk,bhkd->bhqd", pw, v).transpose(0, 2, 1, 3).reshape(bs, S, D)
    attn = jnp.einsum("bsd,ed->bse", o, p["wo"]) + p["bo"][0]

    def ln(z, g, b):
        mu = jnp.mean(z, -1, keepdims=True)
        var = jnp.mean((z - mu) ** 2, -1, keepdims=True)
        return (z - mu) * jax.lax.rsqrt(var + 1e-5) * g[0] + b[0]

    x = ln(x + attn, p["g1"], p["be1"])
    ff = jnp.einsum("bsf,df->bsd",
                    jnp.maximum(jnp.einsum("bsd,fd->bsf", x, p["w1"]) + p["b1"][0], 0.0),
                    p["w2"]) + p["b2"][0]
    return ln(x + ff, p["g2"], p["be2"])


def ref_forward(x, embedding, layer_params, nhead):
    bs, seq_len, D = x.shape
    start = jnp.broadcast_to(embedding[0], (bs, 1, D))
    end = jnp.broadcast_to(embedding[2], (bs, 1, D))
    cls = jnp.broadcast_to(embedding[3], (bs, 1, D))
    x = x + embedding[1]
    x = jnp.concatenate([start, x, end, cls], axis=1)
    for p in layer_params:
        x = ref_layer(x, p, nhead)
    return x


# ----------------------------------------------------------------------------
# Deterministic parameter construction
# ----------------------------------------------------------------------------
def make_params(key, num_layers, d_model, nhead, dim_feedforward):
    keys = jax.random.split(key, 2 + num_layers)
    emb = 0.02 * jax.random.normal(keys[0], (4, d_model), jnp.float32)
    emb = emb.at[0].set(0.0)            # padding_idx=0 (START) row zeroed

    layer_params = []
    for li in range(num_layers):
        lk = jax.random.split(keys[2 + li], 8)
        p = dict(
            wqkv=0.02 * jax.random.normal(lk[0], (3 * d_model, d_model), jnp.float32),
            bqkv=0.01 * jax.random.normal(lk[1], (1, 3 * d_model), jnp.float32),
            wo=0.02 * jax.random.normal(lk[2], (d_model, d_model), jnp.float32),
            bo=0.01 * jax.random.normal(lk[3], (1, d_model), jnp.float32),
            w1=0.02 * jax.random.normal(lk[4], (dim_feedforward, d_model), jnp.float32),
            b1=0.01 * jax.random.normal(lk[5], (1, dim_feedforward), jnp.float32),
            w2=0.02 * jax.random.normal(lk[6], (d_model, dim_feedforward), jnp.float32),
            b2=0.01 * jax.random.normal(lk[7], (1, d_model), jnp.float32),
            g1=jnp.ones((1, d_model), jnp.float32),
            be1=jnp.zeros((1, d_model), jnp.float32),
            g2=jnp.ones((1, d_model), jnp.float32),
            be2=jnp.zeros((1, d_model), jnp.float32),
        )
        layer_params.append(p)
    return emb, layer_params


if __name__ == "__main__":
    bs, seq_len, d_model = 2, 8, 32
    nhead, dim_feedforward, num_layers = 4, 64, 2

    key = jax.random.PRNGKey(0)
    kx, kp = jax.random.split(key)
    x = jax.random.normal(kx, (bs, seq_len, d_model), jnp.float32)
    embedding, layer_params = make_params(kp, num_layers, d_model, nhead,
                                          dim_feedforward)

    out = binocularformer_encoder(x, embedding, layer_params, nhead)
    out = jax.block_until_ready(out)

    ref = ref_forward(x, embedding, layer_params, nhead)
    assert out.shape == (bs, seq_len + 3, d_model)
    # Tolerance sized for bf16 MXU operands (weights + activations cast to bf16
    # at the matmuls, f32 accumulation / LayerNorm / exact softmax).
    assert jnp.allclose(out, ref, atol=2e-2, rtol=2e-2), "mismatch vs reference"

    print("KERNEL_OK")
</pallas_src>

<mosaic_0001>
module attributes {stable_mosaic.version = 11 : i64} {
  func.func @fused_encoder_kernel(%arg0: i32, %arg1: i32, %arg2: memref<1x11x32xf32, #tpu.memory_space<vmem>>, %arg3: memref<1x32x96xbf16, #tpu.memory_space<vmem>>, %arg4: memref<1x1x96xf32, #tpu.memory_space<vmem>>, %arg5: memref<1x32x32xbf16, #tpu.memory_space<vmem>>, %arg6: memref<1x1x32xf32, #tpu.memory_space<vmem>>, %arg7: memref<1x32x64xbf16, #tpu.memory_space<vmem>>, %arg8: memref<1x1x64xf32, #tpu.memory_space<vmem>>, %arg9: memref<1x64x32xbf16, #tpu.memory_space<vmem>>, %arg10: memref<1x1x32xf32, #tpu.memory_space<vmem>>, %arg11: memref<1x1x32xf32, #tpu.memory_space<vmem>>, %arg12: memref<1x1x32xf32, #tpu.memory_space<vmem>>, %arg13: memref<1x1x32xf32, #tpu.memory_space<vmem>>, %arg14: memref<1x1x32xf32, #tpu.memory_space<vmem>>, %arg15: memref<1x11x32xf32, #tpu.memory_space<vmem>>, %arg16: memref<11x32xf32, #tpu.memory_space<vmem>>) attributes {dimension_semantics = [#tpu.dimension_semantics<parallel>, #tpu.dimension_semantics<arbitrary>], iteration_bounds = array<i64: 2, 2>, scalar_prefetch = 0 : i64, scratch_operands = 1 : i64, tpu.core_type = #tpu.core_type<tc>, window_params = [{transform_indices = @transform_0, window_bounds = array<i64: 1, 11, 32>}, {transform_indices = @transform_1, window_bounds = array<i64: 1, 32, 96>}, {transform_indices = @transform_2, window_bounds = array<i64: 1, 1, 96>}, {transform_indices = @transform_3, window_bounds = array<i64: 1, 32, 32>}, {transform_indices = @transform_4, window_bounds = array<i64: 1, 1, 32>}, {transform_indices = @transform_5, window_bounds = array<i64: 1, 32, 64>}, {transform_indices = @transform_6, window_bounds = array<i64: 1, 1, 64>}, {transform_indices = @transform_7, window_bounds = array<i64: 1, 64, 32>}, {transform_indices = @transform_8, window_bounds = array<i64: 1, 1, 32>}, {transform_indices = @transform_9, window_bounds = array<i64: 1, 1, 32>}, {transform_indices = @transform_10, window_bounds = array<i64: 1, 1, 32>}, {transform_indices = @transform_11, window_bounds = array<i64: 1, 1, 32>}, {transform_indices = @transform_12, window_bounds = array<i64: 1, 1, 32>}, {transform_indices = @transform_13, window_bounds = array<i64: 1, 11, 32>}]} {
    %c0_i32 = arith.constant 0 : i32
    %0 = arith.cmpi eq, %arg1, %c0_i32 : i32
    %1 = arith.extui %0 : i1 to i32
    %c0_i32_0 = arith.constant 0 : i32
    %2 = arith.cmpi ne, %1, %c0_i32_0 : i32
    scf.if %2 {
      %c0_71 = arith.constant 0 : index
      %c0_72 = arith.constant 0 : index
      %c0_73 = arith.constant 0 : index
      %169 = vector.load %arg2[%c0_71, %c0_72, %c0_73] : memref<1x11x32xf32, #tpu.memory_space<vmem>>, vector<1x11x32xf32>
      %170 = vector.shape_cast %169 : vector<1x11x32xf32> to vector<11x32xf32>
      %c0_74 = arith.constant 0 : index
      %c0_75 = arith.constant 0 : index
      %171 = vector.load %arg16[%c0_74, %c0_75] : memref<11x32xf32, #tpu.memory_space<vmem>>, vector<11x32xf32>
      tpu.vector_store %arg16[%c0_74, %c0_75], %170 {strides = array<i32>} : memref<11x32xf32, #tpu.memory_space<vmem>>, vector<11x32xf32>,
    } else {
    }
    %c0 = arith.constant 0 : index
    %c0_1 = arith.constant 0 : index
    %3 = vector.load %arg16[%c0, %c0_1] : memref<11x32xf32, #tpu.memory_space<vmem>>, vector<11x32xf32>
    %c0_2 = arith.constant 0 : index
    %c0_3 = arith.constant 0 : index
    %c0_4 = arith.constant 0 : index
    %4 = vector.load %arg3[%c0_2, %c0_3, %c0_4] : memref<1x32x96xbf16, #tpu.memory_space<vmem>>, vector<1x32x96xbf16>
    %5 = vector.shape_cast %4 : vector<1x32x96xbf16> to vector<32x96xbf16>
    %c0_5 = arith.constant 0 : index
    %c0_6 = arith.constant 0 : index
    %c0_7 = arith.constant 0 : index
    %6 = vector.load %arg4[%c0_5, %c0_6, %c0_7] : memref<1x1x96xf32, #tpu.memory_space<vmem>>, vector<1x1x96xf32>
    %7 = vector.shape_cast %6 : vector<1x1x96xf32> to vector<1x96xf32>
    %c0_8 = arith.constant 0 : index
    %c0_9 = arith.constant 0 : index
    %c0_10 = arith.constant 0 : index
    %8 = vector.load %arg5[%c0_8, %c0_9, %c0_10] : memref<1x32x32xbf16, #tpu.memory_space<vmem>>, vector<1x32x32xbf16>
    %9 = vector.shape_cast %8 : vector<1x32x32xbf16> to vector<32x32xbf16>
    %c0_11 = arith.constant 0 : index
    %c0_12 = arith.constant 0 : index
    %c0_13 = arith.constant 0 : index
    %10 = vector.load %arg6[%c0_11, %c0_12, %c0_13] : memref<1x1x32xf32, #tpu.memory_space<vmem>>, vector<1x1x32xf32>
    %11 = vector.shape_cast %10 : vector<1x1x32xf32> to vector<1x32xf32>
    %c0_14 = arith.constant 0 : index
    %c0_15 = arith.constant 0 : index
    %c0_16 = arith.constant 0 : index
    %12 = vector.load %arg7[%c0_14, %c0_15, %c0_16] : memref<1x32x64xbf16, #tpu.memory_space<vmem>>, vector<1x32x64xbf16>
    %13 = vector.shape_cast %12 : vector<1x32x64xbf16> to vector<32x64xbf16>
    %c0_17 = arith.constant 0 : index
    %c0_18 = arith.constant 0 : index
    %c0_19 = arith.constant 0 : index
    %14 = vector.load %arg8[%c0_17, %c0_18, %c0_19] : memref<1x1x64xf32, #tpu.memory_space<vmem>>, vector<1x1x64xf32>
    %15 = vector.shape_cast %14 : vector<1x1x64xf32> to vector<1x64xf32>
    %c0_20 = arith.constant 0 : index
    %c0_21 = arith.constant 0 : index
    %c0_22 = arith.constant 0 : index
    %16 = vector.load %arg9[%c0_20, %c0_21, %c0_22] : memref<1x64x32xbf16, #tpu.memory_space<vmem>>, vector<1x64x32xbf16>
    %17 = vector.shape_cast %16 : vector<1x64x32xbf16> to vector<64x32xbf16>
    %c0_23 = arith.constant 0 : index
    %c0_24 = arith.constant 0 : index
    %c0_25 = arith.constant 0 : index
    %18 = vector.load %arg10[%c0_23, %c0_24, %c0_25] : memref<1x1x32xf32, #tpu.memory_space<vmem>>, vector<1x1x32xf32>
    %19 = vector.shape_cast %18 : vector<1x1x32xf32> to vector<1x32xf32>
    %20 = arith.truncf %3 : vector<11x32xf32> to vector<11x32xbf16>
    %cst = arith.constant dense<0.000000e+00> : vector<11x96xf32>
    %21 = tpu.matmul %20, %5, %cst {dimension_numbers = #tpu.dot_dimension_numbers<[1], [0], [0], [1], [0, 0, 1, 1], [], []>} : vector<11x32xbf16>, vector<32x96xbf16>, vector<11x96xf32> -> vector<11x96xf32>
    %22 = vector.broadcast %7 : vector<1x96xf32> to vector<11x96xf32>
    %23 = arith.addf %21, %22 : vector<11x96xf32>
    %24 = vector.extract_strided_slice %23 {offsets = [0, 0], sizes = [11, 8], strides = [1, 1]} : vector<11x96xf32> to vector<11x8xf32>
    %25 = arith.truncf %24 : vector<11x8xf32> to vector<11x8xbf16>
    %26 = vector.extract_strided_slice %23 {offsets = [0, 32], sizes = [11, 8], strides = [1, 1]} : vector<11x96xf32> to vector<11x8xf32>
    %27 = arith.truncf %26 : vector<11x8xf32> to vector<11x8xbf16>
    %28 = vector.extract_strided_slice %23 {offsets = [0, 64], sizes = [11, 8], strides = [1, 1]} : vector<11x96xf32> to vector<11x8xf32>
    %29 = arith.truncf %28 : vector<11x8xf32> to vector<11x8xbf16>
    %cst_26 = arith.constant dense<0.000000e+00> : vector<11x11xf32>
    %30 = tpu.matmul %25, %27, %cst_26 {dimension_numbers = #tpu.dot_dimension_numbers<[1], [1], [0], [0], [0, 0, 1, 0], [], []>} : vector<11x8xbf16>, vector<11x8xbf16>, vector<11x11xf32> -> vector<11x11xf32>
    %cst_27 = arith.constant dense<0xFF800000> : vector<11xf32>
    %31 = vector.multi_reduction <maximumf>, %30, %cst_27 [1] : vector<11x11xf32> to vector<11xf32>
    %32 = vector.shape_cast %31 : vector<11xf32> to vector<11x1xf32>
    %33 = vector.broadcast %32 : vector<11x1xf32> to vector<11x11xf32>
    %34 = arith.subf %30, %33 : vector<11x11xf32>
    %35 = math.exp %34 : vector<11x11xf32>
    %cst_28 = arith.constant dense<0.000000e+00> : vector<11xf32>
    %36 = vector.multi_reduction <add>, %35, %cst_28 [1] : vector<11x11xf32> to vector<11xf32>
    %37 = vector.shape_cast %36 : vector<11xf32> to vector<11x1xf32>
    %38 = arith.truncf %35 : vector<11x11xf32> to vector<11x11xbf16>
    %cst_29 = arith.constant dense<0.000000e+00> : vector<11x8xf32>
    %39 = tpu.matmul %38, %29, %cst_29 {dimension_numbers = #tpu.dot_dimension_numbers<[1], [0], [0], [1], [0, 0, 1, 1], [], []>} : vector<11x11xbf16>, vector<11x8xbf16>, vector<11x8xf32> -> vector<11x8xf32>
    %40 = vector.broadcast %37 : vector<11x1xf32> to vector<11x8xf32>
    %41 = arith.divf %39, %40 : vector<11x8xf32>
    %42 = vector.extract_strided_slice %23 {offsets = [0, 8], sizes = [11, 8], strides = [1, 1]} : vector<11x96xf32> to vector<11x8xf32>
    %43 = arith.truncf %42 : vector<11x8xf32> to vector<11x8xbf16>
    %44 = vector.extract_strided_slice %23 {offsets = [0, 40], sizes = [11, 8], strides = [1, 1]} : vector<11x96xf32> to vector<11x8xf32>
    %45 = arith.truncf %44 : vector<11x8xf32> to vector<11x8xbf16>
    %46 = vector.extract_strided_slice %23 {offsets = [0, 72], sizes = [11, 8], strides = [1, 1]} : vector<11x96xf32> to vector<11x8xf32>
    %47 = arith.truncf %46 : vector<11x8xf32> to vector<11x8xbf16>
    %cst_30 = arith.constant dense<0.000000e+00> : vector<11x11xf32>
    %48 = tpu.matmul %43, %45, %cst_30 {dimension_numbers = #tpu.dot_dimension_numbers<[1], [1], [0], [0], [0, 0, 1, 0], [], []>} : vector<11x8xbf16>, vector<11x8xbf16>, vector<11x11xf32> -> vector<11x11xf32>
    %cst_31 = arith.constant dense<0xFF800000> : vector<11xf32>
    %49 = vector.multi_reduction <maximumf>, %48, %cst_31 [1] : vector<11x11xf32> to vector<11xf32>
    %50 = vector.shape_cast %49 : vector<11xf32> to vector<11x1xf32>
    %51 = vector.broadcast %50 : vector<11x1xf32> to vector<11x11xf32>
    %52 = arith.subf %48, %51 : vector<11x11xf32>
    %53 = math.exp %52 : vector<11x11xf32>
    %cst_32 = arith.constant dense<0.000000e+00> : vector<11xf32>
    %54 = vector.multi_reduction <add>, %53, %cst_32 [1] : vector<11x11xf32> to vector<11xf32>
    %55 = vector.shape_cast %54 : vector<11xf32> to vector<11x1xf32>
    %56 = arith.truncf %53 : vector<11x11xf32> to vector<11x11xbf16>
    %cst_33 = arith.constant dense<0.000000e+00> : vector<11x8xf32>
    %57 = tpu.matmul %56, %47, %cst_33 {dimension_numbers = #tpu.dot_dimension_numbers<[1], [0], [0], [1], [0, 0, 1, 1], [], []>} : vector<11x11xbf16>, vector<11x8xbf16>, vector<11x8xf32> -> vector<11x8xf32>
    %58 = vector.broadcast %55 : vector<11x1xf32> to vector<11x8xf32>
    %59 = arith.divf %57, %58 : vector<11x8xf32>
    %60 = vector.extract_strided_slice %23 {offsets = [0, 16], sizes = [11, 8], strides = [1, 1]} : vector<11x96xf32> to vector<11x8xf32>
    %61 = arith.truncf %60 : vector<11x8xf32> to vector<11x8xbf16>
    %62 = vector.extract_strided_slice %23 {offsets = [0, 48], sizes = [11, 8], strides = [1, 1]} : vector<11x96xf32> to vector<11x8xf32>
    %63 = arith.truncf %62 : vector<11x8xf32> to vector<11x8xbf16>
    %64 = vector.extract_strided_slice %23 {offsets = [0, 80], sizes = [11, 8], strides = [1, 1]} : vector<11x96xf32> to vector<11x8xf32>
    %65 = arith.truncf %64 : vector<11x8xf32> to vector<11x8xbf16>
    %cst_34 = arith.constant dense<0.000000e+00> : vector<11x11xf32>
    %66 = tpu.matmul %61, %63, %cst_34 {dimension_numbers = #tpu.dot_dimension_numbers<[1], [1], [0], [0], [0, 0, 1, 0], [], []>} : vector<11x8xbf16>, vector<11x8xbf16>, vector<11x11xf32> -> vector<11x11xf32>
    %cst_35 = arith.constant dense<0xFF800000> : vector<11xf32>
    %67 = vector.multi_reduction <maximumf>, %66, %cst_35 [1] : vector<11x11xf32> to vector<11xf32>
    %68 = vector.shape_cast %67 : vector<11xf32> to vector<11x1xf32>
    %69 = vector.broadcast %68 : vector<11x1xf32> to vector<11x11xf32>
    %70 = arith.subf %66, %69 : vector<11x11xf32>
    %71 = math.exp %70 : vector<11x11xf32>
    %cst_36 = arith.constant dense<0.000000e+00> : vector<11xf32>
    %72 = vector.multi_reduction <add>, %71, %cst_36 [1] : vector<11x11xf32> to vector<11xf32>
    %73 = vector.shape_cast %72 : vector<11xf32> to vector<11x1xf32>
    %74 = arith.truncf %71 : vector<11x11xf32> to vector<11x11xbf16>
    %cst_37 = arith.constant dense<0.000000e+00> : vector<11x8xf32>
    %75 = tpu.matmul %74, %65, %cst_37 {dimension_numbers = #tpu.dot_dimension_numbers<[1], [0], [0], [1], [0, 0, 1, 1], [], []>} : vector<11x11xbf16>, vector<11x8xbf16>, vector<11x8xf32> -> vector<11x8xf32>
    %76 = vector.broadcast %73 : vector<11x1xf32> to vector<11x8xf32>
    %77 = arith.divf %75, %76 : vector<11x8xf32>
    %78 = vector.extract_strided_slice %23 {offsets = [0, 24], sizes = [11, 8], strides = [1, 1]} : vector<11x96xf32> to vector<11x8xf32>
    %79 = arith.truncf %78 : vector<11x8xf32> to vector<11x8xbf16>
    %80 = vector.extract_strided_slice %23 {offsets = [0, 56], sizes = [11, 8], strides = [1, 1]} : vector<11x96xf32> to vector<11x8xf32>
    %81 = arith.truncf %80 : vector<11x8xf32> to vector<11x8xbf16>
    %82 = vector.extract_strided_slice %23 {offsets = [0, 88], sizes = [11, 8], strides = [1, 1]} : vector<11x96xf32> to vector<11x8xf32>
    %83 = arith.truncf %82 : vector<11x8xf32> to vector<11x8xbf16>
    %cst_38 = arith.constant dense<0.000000e+00> : vector<11x11xf32>
    %84 = tpu.matmul %79, %81, %cst_38 {dimension_numbers = #tpu.dot_dimension_numbers<[1], [1], [0], [0], [0, 0, 1, 0], [], []>} : vector<11x8xbf16>, vector<11x8xbf16>, vector<11x11xf32> -> vector<11x11xf32>
    %cst_39 = arith.constant dense<0xFF800000> : vector<11xf32>
    %85 = vector.multi_reduction <maximumf>, %84, %cst_39 [1] : vector<11x11xf32> to vector<11xf32>
    %86 = vector.shape_cast %85 : vector<11xf32> to vector<11x1xf32>
    %87 = vector.broadcast %86 : vector<11x1xf32> to vector<11x11xf32>
    %88 = arith.subf %84, %87 : vector<11x11xf32>
    %89 = math.exp %88 : vector<11x11xf32>
    %cst_40 = arith.constant dense<0.000000e+00> : vector<11xf32>
    %90 = vector.multi_reduction <add>, %89, %cst_40 [1] : vector<11x11xf32> to vector<11xf32>
    %91 = vector.shape_cast %90 : vector<11xf32> to vector<11x1xf32>
    %92 = arith.truncf %89 : vector<11x11xf32> to vector<11x11xbf16>
    %cst_41 = arith.constant dense<0.000000e+00> : vector<11x8xf32>
    %93 = tpu.matmul %92, %83, %cst_41 {dimension_numbers = #tpu.dot_dimension_numbers<[1], [0], [0], [1], [0, 0, 1, 1], [], []>} : vector<11x11xbf16>, vector<11x8xbf16>, vector<11x8xf32> -> vector<11x8xf32>
    %94 = vector.broadcast %91 : vector<11x1xf32> to vector<11x8xf32>
    %95 = arith.divf %93, %94 : vector<11x8xf32>
    %96 = tpu.concatenate %41, %59, %77, %95 in 1 : vector<11x8xf32>, vector<11x8xf32>, vector<11x8xf32>, vector<11x8xf32> -> vector<11x32xf32>
    %97 = arith.truncf %96 : vector<11x32xf32> to vector<11x32xbf16>
    %cst_42 = arith.constant dense<0.000000e+00> : vector<11x32xf32>
    %98 = tpu.matmul %97, %9, %cst_42 {dimension_numbers = #tpu.dot_dimension_numbers<[1], [0], [0], [1], [0, 0, 1, 1], [], []>} : vector<11x32xbf16>, vector<32x32xbf16>, vector<11x32xf32> -> vector<11x32xf32>
    %99 = vector.broadcast %11 : vector<1x32xf32> to vector<11x32xf32>
    %100 = arith.addf %98, %99 : vector<11x32xf32>
    %101 = arith.addf %3, %100 : vector<11x32xf32>
    %cst_43 = arith.constant dense<0.000000e+00> : vector<11xf32>
    %102 = vector.multi_reduction <add>, %101, %cst_43 [1] : vector<11x32xf32> to vector<11xf32>
    %103 = vector.shape_cast %102 : vector<11xf32> to vector<11x1xf32>
    %cst_44 = arith.constant 3.200000e+01 : f32
    %104 = vector.broadcast %cst_44 : f32 to vector<11x1xf32>
    %105 = arith.divf %103, %104 : vector<11x1xf32>
    %106 = vector.broadcast %105 : vector<11x1xf32> to vector<11x32xf32>
    %107 = arith.subf %101, %106 : vector<11x32xf32>
    %108 = arith.mulf %107, %107 : vector<11x32xf32>
    %cst_45 = arith.constant dense<0.000000e+00> : vector<11xf32>
    %109 = vector.multi_reduction <add>, %108, %cst_45 [1] : vector<11x32xf32> to vector<11xf32>
    %110 = vector.shape_cast %109 : vector<11xf32> to vector<11x1xf32>
    %cst_46 = arith.constant 3.200000e+01 : f32
    %111 = vector.broadcast %cst_46 : f32 to vector<11x1xf32>
    %112 = arith.divf %110, %111 : vector<11x1xf32>
    %113 = vector.broadcast %105 : vector<11x1xf32> to vector<11x32xf32>
    %114 = arith.subf %101, %113 : vector<11x32xf32>
    %cst_47 = arith.constant 9.99999974E-6 : f32
    %115 = vector.broadcast %cst_47 : f32 to vector<11x1xf32>
    %116 = arith.addf %112, %115 : vector<11x1xf32>
    %117 = math.rsqrt %116 : vector<11x1xf32>
    %118 = vector.broadcast %117 : vector<11x1xf32> to vector<11x32xf32>
    %119 = arith.mulf %114, %118 : vector<11x32xf32>
    %c0_48 = arith.constant 0 : index
    %c0_49 = arith.constant 0 : index
    %c0_50 = arith.constant 0 : index
    %120 = vector.load %arg11[%c0_48, %c0_49, %c0_50] : memref<1x1x32xf32, #tpu.memory_space<vmem>>, vector<1x1x32xf32>
    %121 = vector.shape_cast %120 : vector<1x1x32xf32> to vector<1x32xf32>
    %122 = vector.broadcast %121 : vector<1x32xf32> to vector<11x32xf32>
    %123 = arith.mulf %119, %122 : vector<11x32xf32>
    %c0_51 = arith.constant 0 : index
    %c0_52 = arith.constant 0 : index
    %c0_53 = arith.constant 0 : index
    %124 = vector.load %arg12[%c0_51, %c0_52, %c0_53] : memref<1x1x32xf32, #tpu.memory_space<vmem>>, vector<1x1x32xf32>
    %125 = vector.shape_cast %124 : vector<1x1x32xf32> to vector<1x32xf32>
    %126 = vector.broadcast %125 : vector<1x32xf32> to vector<11x32xf32>
    %127 = arith.addf %123, %126 : vector<11x32xf32>
    %128 = arith.truncf %127 : vector<11x32xf32> to vector<11x32xbf16>
    %cst_54 = arith.constant dense<0.000000e+00> : vector<11x64xf32>
    %129 = tpu.matmul %128, %13, %cst_54 {dimension_numbers = #tpu.dot_dimension_numbers<[1], [0], [0], [1], [0, 0, 1, 1], [], []>} : vector<11x32xbf16>, vector<32x64xbf16>, vector<11x64xf32> -> vector<11x64xf32>
    %130 = vector.broadcast %15 : vector<1x64xf32> to vector<11x64xf32>
    %131 = arith.addf %129, %130 : vector<11x64xf32>
    %cst_55 = arith.constant 0.000000e+00 : f32
    %132 = vector.broadcast %cst_55 : f32 to vector<11x64xf32>
    %133 = arith.maximumf %131, %132 : vector<11x64xf32>
    %134 = arith.truncf %133 : vector<11x64xf32> to vector<11x64xbf16>
    %cst_56 = arith.constant dense<0.000000e+00> : vector<11x32xf32>
    %135 = tpu.matmul %134, %17, %cst_56 {dimension_numbers = #tpu.dot_dimension_numbers<[1], [0], [0], [1], [0, 0, 1, 1], [], []>} : vector<11x64xbf16>, vector<64x32xbf16>, vector<11x32xf32> -> vector<11x32xf32>
    %136 = vector.broadcast %19 : vector<1x32xf32> to vector<11x32xf32>
    %137 = arith.addf %135, %136 : vector<11x32xf32>
    %138 = arith.addf %127, %137 : vector<11x32xf32>
    %cst_57 = arith.constant dense<0.000000e+00> : vector<11xf32>
    %139 = vector.multi_reduction <add>, %138, %cst_57 [1] : vector<11x32xf32> to vector<11xf32>
    %140 = vector.shape_cast %139 : vector<11xf32> to vector<11x1xf32>
    %cst_58 = arith.constant 3.200000e+01 : f32
    %141 = vector.broadcast %cst_58 : f32 to vector<11x1xf32>
    %142 = arith.divf %140, %141 : vector<11x1xf32>
    %143 = vector.broadcast %142 : vector<11x1xf32> to vector<11x32xf32>
    %144 = arith.subf %138, %143 : vector<11x32xf32>
    %145 = arith.mulf %144, %144 : vector<11x32xf32>
    %cst_59 = arith.constant dense<0.000000e+00> : vector<11xf32>
    %146 = vector.multi_reduction <add>, %145, %cst_59 [1] : vector<11x32xf32> to vector<11xf32>
    %147 = vector.shape_cast %146 : vector<11xf32> to vector<11x1xf32>
    %cst_60 = arith.constant 3.200000e+01 : f32
    %148 = vector.broadcast %cst_60 : f32 to vector<11x1xf32>
    %149 = arith.divf %147, %148 : vector<11x1xf32>
    %150 = vector.broadcast %142 : vector<11x1xf32> to vector<11x32xf32>
    %151 = arith.subf %138, %150 : vector<11x32xf32>
    %cst_61 = arith.constant 9.99999974E-6 : f32
    %152 = vector.broadcast %cst_61 : f32 to vector<11x1xf32>
    %153 = arith.addf %149, %152 : vector<11x1xf32>
    %154 = math.rsqrt %153 : vector<11x1xf32>
    %155 = vector.broadcast %154 : vector<11x1xf32> to vector<11x32xf32>
    %156 = arith.mulf %151, %155 : vector<11x32xf32>
    %c0_62 = arith.constant 0 : index
    %c0_63 = arith.constant 0 : index
    %c0_64 = arith.constant 0 : index
    %157 = vector.load %arg13[%c0_62, %c0_63, %c0_64] : memref<1x1x32xf32, #tpu.memory_space<vmem>>, vector<1x1x32xf32>
    %158 = vector.shape_cast %157 : vector<1x1x32xf32> to vector<1x32xf32>
    %159 = vector.broadcast %158 : vector<1x32xf32> to vector<11x32xf32>
    %160 = arith.mulf %156, %159 : vector<11x32xf32>
    %c0_65 = arith.constant 0 : index
    %c0_66 = arith.constant 0 : index
    %c0_67 = arith.constant 0 : index
    %161 = vector.load %arg14[%c0_65, %c0_66, %c0_67] : memref<1x1x32xf32, #tpu.memory_space<vmem>>, vector<1x1x32xf32>
    %162 = vector.shape_cast %161 : vector<1x1x32xf32> to vector<1x32xf32>
    %163 = vector.broadcast %162 : vector<1x32xf32> to vector<11x32xf32>
    %164 = arith.addf %160, %163 : vector<11x32xf32>
    %c0_68 = arith.constant 0 : index
    %c0_69 = arith.constant 0 : index
    %165 = vector.load %arg16[%c0_68, %c0_69] : memref<11x32xf32, #tpu.memory_space<vmem>>, vector<11x32xf32>
    tpu.vector_store %arg16[%c0_68, %c0_69], %164 {strides = array<i32>} : memref<11x32xf32, #tpu.memory_space<vmem>>, vector<11x32xf32>,
    %c1_i32 = arith.constant 1 : i32
    %166 = arith.cmpi eq, %arg1, %c1_i32 : i32
    %167 = arith.extui %166 : i1 to i32
    %c0_i32_70 = arith.constant 0 : i32
    %168 = arith.cmpi ne, %167, %c0_i32_70 : i32
    scf.if %168 {
      %c0_71 = arith.constant 0 : index
      %c0_72 = arith.constant 0 : index
      %c0_73 = arith.constant 0 : index
      %169 = vector.load %arg15[%c0_71, %c0_72, %c0_73] : memref<1x11x32xf32, #tpu.memory_space<vmem>>, vector<1x11x32xf32>
      %170 = vector.shape_cast %169 : vector<1x11x32xf32> to vector<11x32xf32>
      %171 = vector.shape_cast %164 : vector<11x32xf32> to vector<1x11x32xf32>
      tpu.vector_store %arg15[%c0_71, %c0_72, %c0_73], %171 {strides = array<i32>} : memref<1x11x32xf32, #tpu.memory_space<vmem>>, vector<1x11x32xf32>,
    } else {
    }
    return
  }
  func.func @transform_0(%arg0: i32, %arg1: i32) -> (i32, i32, i32) {
    %c0_i32 = arith.constant 0 : i32
    %c0_i32_0 = arith.constant 0 : i32
    %c0_i32_1 = arith.constant 0 : i32
    return %arg0, %c0_i32, %c0_i32_0 : i32, i32, i32
  }
  func.func @transform_1(%arg0: i32, %arg1: i32) -> (i32, i32, i32) {
    %c0_i32 = arith.constant 0 : i32
    %c0_i32_0 = arith.constant 0 : i32
    %c0_i32_1 = arith.constant 0 : i32
    return %arg1, %c0_i32, %c0_i32_0 : i32, i32, i32
  }
  func.func @transform_2(%arg0: i32, %arg1: i32) -> (i32, i32, i32) {
    %c0_i32 = arith.constant 0 : i32
    %c0_i32_0 = arith.constant 0 : i32
    %c0_i32_1 = arith.constant 0 : i32
    return %arg1, %c0_i32, %c0_i32_0 : i32, i32, i32
  }
  func.func @transform_3(%arg0: i32, %arg1: i32) -> (i32, i32, i32) {
    %c0_i32 = arith.constant 0 : i32
    %c0_i32_0 = arith.constant 0 : i32
    %c0_i32_1 = arith.constant 0 : i32
    return %arg1, %c0_i32, %c0_i32_0 : i32, i32, i32
  }
  func.func @transform_4(%arg0: i32, %arg1: i32) -> (i32, i32, i32) {
    %c0_i32 = arith.constant 0 : i32
    %c0_i32_0 = arith.constant 0 : i32
    %c0_i32_1 = arith.constant 0 : i32
    return %arg1, %c0_i32, %c0_i32_0 : i32, i32, i32
  }
  func.func @transform_5(%arg0: i32, %arg1: i32) -> (i32, i32, i32) {
    %c0_i32 = arith.constant 0 : i32
    %c0_i32_0 = arith.constant 0 : i32
    %c0_i32_1 = arith.constant 0 : i32
    return %arg1, %c0_i32, %c0_i32_0 : i32, i32, i32
  }
  func.func @transform_6(%arg0: i32, %arg1: i32) -> (i32, i32, i32) {
    %c0_i32 = arith.constant 0 : i32
    %c0_i32_0 = arith.constant 0 : i32
    %c0_i32_1 = arith.constant 0 : i32
    return %arg1, %c0_i32, %c0_i32_0 : i32, i32, i32
  }
  func.func @transform_7(%arg0: i32, %arg1: i32) -> (i32, i32, i32) {
    %c0_i32 = arith.constant 0 : i32
    %c0_i32_0 = arith.constant 0 : i32
    %c0_i32_1 = arith.constant 0 : i32
    return %arg1, %c0_i32, %c0_i32_0 : i32, i32, i32
  }
  func.func @transform_8(%arg0: i32, %arg1: i32) -> (i32, i32, i32) {
    %c0_i32 = arith.constant 0 : i32
    %c0_i32_0 = arith.constant 0 : i32
    %c0_i32_1 = arith.constant 0 : i32
    return %arg1, %c0_i32, %c0_i32_0 : i32, i32, i32
  }
  func.func @transform_9(%arg0: i32, %arg1: i32) -> (i32, i32, i32) {
    %c0_i32 = arith.constant 0 : i32
    %c0_i32_0 = arith.constant 0 : i32
    %c0_i32_1 = arith.constant 0 : i32
    return %arg1, %c0_i32, %c0_i32_0 : i32, i32, i32
  }
  func.func @transform_10(%arg0: i32, %arg1: i32) -> (i32, i32, i32) {
    %c0_i32 = arith.constant 0 : i32
    %c0_i32_0 = arith.constant 0 : i32
    %c0_i32_1 = arith.constant 0 : i32
    return %arg1, %c0_i32, %c0_i32_0 : i32, i32, i32
  }
  func.func @transform_11(%arg0: i32, %arg1: i32) -> (i32, i32, i32) {
    %c0_i32 = arith.constant 0 : i32
    %c0_i32_0 = arith.constant 0 : i32
    %c0_i32_1 = arith.constant 0 : i32
    return %arg1, %c0_i32, %c0_i32_0 : i32, i32, i32
  }
  func.func @transform_12(%arg0: i32, %arg1: i32) -> (i32, i32, i32) {
    %c0_i32 = arith.constant 0 : i32
    %c0_i32_0 = arith.constant 0 : i32
    %c0_i32_1 = arith.constant 0 : i32
    return %arg1, %c0_i32, %c0_i32_0 : i32, i32, i32
  }
  func.func @transform_13(%arg0: i32, %arg1: i32) -> (i32, i32, i32) {
    %c0_i32 = arith.constant 0 : i32
    %c0_i32_0 = arith.constant 0 : i32
    %c0_i32_1 = arith.constant 0 : i32
    return %arg0, %c0_i32, %c0_i32_0 : i32, i32, i32
  }
}

</mosaic_0001>

<bundles_post_ra>
// kernel: tpu_custom_call.1
= control target key start
LH: loop header
LB: loop body
LE: loop exit
PB: predicated region body
PF: predicated region fallthrough
CT: control target
= control target key end

     0   :  { %s2189_s25 = smov 0   ;;  %s2191_s26 = smov 0   ;;  %s2491_s0 = inlined_call_operand.vmem [shape: f32[2,11,32], index: 0, kind: input, shape index: {}]   ;;  %s2492_s1 = inlined_call_operand.vmem [shape: bf16[2,32,96], index: 1, kind: input, shape index: {}]   ;;  %s2493_s2 = inlined_call_operand.vmem [shape: f32[2,1,96], index: 2, kind: input, shape index: {}]   ;;  %s2494_s3 = inlined_call_operand.vmem [shape: bf16[2,32,32], index: 3, kind: input, shape index: {}]   ;;  %s2495_s4 = inlined_call_operand.vmem [shape: f32[2,1,32], index: 4, kind: input, shape index: {}]   ;;  %s2496_s5 = inlined_call_operand.vmem [shape: bf16[2,32,64], index: 5, kind: input, shape index: {}]   ;;  %s2497_s6 = inlined_call_operand.vmem [shape: f32[2,1,64], index: 6, kind: input, shape index: {}]   ;;  %s2498_s7 = inlined_call_operand.vmem [shape: bf16[2,64,32], index: 7, kind: input, shape index: {}]   ;;  %s2499_s8 = inlined_call_operand.vmem [shape: f32[2,1,32], index: 8, kind: input, shape index: {}]   ;;  %s2500_s9 = inlined_call_operand.vmem [shape: f32[2,1,32], index: 9, kind: input, shape index: {}]   ;;  %s2501_s10 = inlined_call_operand.vmem [shape: f32[2,1,32], index: 10, kind: input, shape index: {}]   ;;  %s2502_s11 = inlined_call_operand.vmem [shape: f32[2,1,32], index: 11, kind: input, shape index: {}]   ;;  %s2503_s12 = inlined_call_operand.vmem [shape: f32[2,1,32], index: 12, kind: input, shape index: {}]   ;;  %s2504_s13 = inlined_call_operand.vmem [shape: f32[2,11,32], index: 13, kind: output, shape index: {}]  }
   0x1   :  { %2510 = sst [smem:[#allocation10_spill]] %s2491_s0  ;;  %s2193_s27 = smov 0  }
   0x2   :  { %2511 = sst [smem:[#allocation11_spill]] %s2492_s1  ;;  %s2195_s28 = smov 0  }
   0x3   :  { %2512 = sst [smem:[#allocation12_spill]] %s2494_s3  ;;  %s2197_s29 = smov 0  }
   0x4   :  { %2513 = sst [smem:[#allocation13_spill]] %s2496_s5 }
   0x5   :  { %2514 = sst [smem:[#allocation14_spill]] %s2498_s7 }
   0x6   :  { %2515 = sst [smem:[#allocation15_spill]] %s2504_s13 }
   0x7 LB: > { %2516 = sst [smem:[#allocation3_spill]] %s2084_s25  ;;  %s32_s30 = sadd.s32 1, %s2092_s27  ;;  %s2100_s29 = sphi %s2197_s29, %s23_s29   ;;  %s2096_s28 = sphi %s2195_s28, %s2540_s28   ;;  %s2092_s27 = sphi %s2193_s27, %s2539_s27   ;;  %s2088_s26 = sphi %s2191_s26, %s2538_s26   ;;  %s2084_s25 = sphi %s2189_s25, %s2537_s25  }
   0x8   : > { %2517 = sst [smem:[#allocation4_spill]] %s2092_s27  ;;  %s35_s14 = sadd.s32 1, %s2096_s28 }
   0x9   : > { %2518 = sst [smem:[#allocation5_spill]] %s2096_s28  ;;  %p33_p0 = scmp.ge.s32.totalorder %s32_s30, 2 }
   0xa   : > { %2519 = sst [smem:[#allocation6_spill]] %s2100_s29  ;;  %p1773_p1 = scmp.ge.s32.totalorder %s2100_s29, 1 }
   0xb   : > { %p503_p2 = scmp.lt.s32.totalorder %s2100_s29, 5  ;;  %s2542_s30 = smov (%p33_p0, %s32_s30), 0 }
   0xc   : > { %2520 = sst [smem:[#allocation7_spill]] %s2542_s30  ;;  %s2544_s14 = smov (!%p33_p0, %s35_s14), %s2096_s28 }
   0xd   : > { %p504_p3 = pnand %p1773_p1, %p503_p2  ;;  %p37_p4 = scmp.ge.s32.totalorder %s2544_s14, 2 }
   0xf   : > { %s2546_s14 = smov (%p37_p4, %s2544_s14), 0  ;;  %507 = sbr.rel (%p504_p3) target bundleno = 2467 (0x9a3), region = 72 }
  0x10   : > { %2521 = sst [smem:[#allocation8_spill]] %s2546_s14 }
  0x16   : > { %p591_p5 = scmp.lt.s32.totalorder %s2088_s26, 1  ;;  %p596_p6 = scmp.lt.s32.totalorder %s2084_s25, 1 }
  0x17   : > { %s2522_s0 = sld [smem:[#allocation10_spill]]  ;;  %s2523_s1 = sld [smem:[#allocation11_spill]] }
  0x18   : > { %s2548_s26 = smov (!%p591_p5, %s2088_s26), 1  ;;  %s2524_s3 = sld [smem:[#allocation12_spill]] }
  0x19   : > { %s2223_s15 = scalar_select %p596_p6, %s2084_s25, 1 }
  0x1a   : > { %s1820_s16 = sshll.u32 %s2548_s26, 4  ;;  %s2526_s5 = sld [smem:[#allocation13_spill]] }
  0x1b   : > { %s1821_s20 = sshll.u32 %s2223_s15, 4  ;;  %s1824_s14 = sshll.u32 %s2223_s15, 5 }
  0x1c   : > { %s2527_s7 = sld [smem:[#allocation14_spill]]  ;;  %s630_s17 = scalar_lea.vmem %s2500_s9, %s2223_s15 }
  0x1d   : > { %s595_s19 = scalar_lea.vmem %s2522_s0, %s1820_s16  ;;  %s600_s23 = scalar_lea.vmem %s2523_s1, %s1821_s20 }
  0x1e   : > { %s2239_s29 = scalar_lea.vmem %s2524_s3, %s1821_s20  ;;  %s633_s13 = scalar_lea.vmem %s2501_s10, %s2223_s15 }
  0x1f   : > { %2525 = sst [smem:[#allocation9_spill]] %s2239_s29  ;;  %s636_s1 = scalar_lea.vmem %s2502_s11, %s2223_s15 }
  0x20   : > { %s2248_s0 = scalar_lea.vmem %s2526_s5, %s1821_s20  ;;  %s639_s24 = scalar_lea.vmem %s2503_s12, %s2223_s15 }
  0x22   : > { %s2262_s29 = scalar_lea.vmem %s2527_s7, %s1824_s14  ;;  %s2528_s14 = sld [smem:[#allocation15_spill]] }
  0x23   : > { %s2529_s7 = sld [smem:[#allocation3_spill]] }
  0x28   : > { %s2283_s28 = scalar_lea.vmem %s2528_s14, %s1820_s16 }
  0x29   : > { %p1786_p7 = scmp.ne.s32.totalorder %s2529_s7, 0 }
  0x2a   : > { %v650_v0 = vld [vmem:[%s595_s19] sm:$0xff] (!%p1786_p7)  ;;  %vm652_vm0 = vcmask (!%p1786_p7), 261120   ;;  %v651_v1 = vld [vmem:[%s595_s19 + $0x8] sm:$0x7] (!%p1786_p7)  ;;  %vm654_vm1 = vcmask (!%p1786_p7), 256000  }
  0x2b   : > { %649 = sbr.rel (%p1786_p7) target bundleno = 50 (0x32), region = 76  ;;  %653 = vst.msk [vmem:[#allocation2] sm:$0xff] (!%p1786_p7), %vm652_vm0, %v650_v0 }
  0x2c   : > { %655 = vst.msk [vmem:[#allocation2 + $0x8] sm:$0x7] (!%p1786_p7), %vm654_vm1, %v651_v1 }
  0x32 PF: > { %v2012_v2 = vld [vmem:[%s600_s23] sm:$0xff]   ;;  %v2102_v3 = vmov 0.0   ;;  %v2013_v4 = vld [vmem:[%s600_s23 + $0x8] sm:$0xff]   ;;  %vm2103_vm2 = vmmov 0   ;;  %vm701_vm3 = vcmask 261120   ;;  %s2530_s16 = scalar_lea.vmem %s2493_s2, %s2223_s15  ;;  %s2104_s19 = smov 120  }
  0x33   : > { %1856 = vmatprep.subr.bf16.mxu0 %v2102_v3  ;;  %1864 = vmatprep.subr.bf16.mxu1 %v2102_v3  ;;  %v2290_v5 = vld [vmem:[#allocation2] sm:$0xff]  ;;  %v2292_v6 = vld [vmem:[#allocation2 + $0x8] sm:$0x7]  ;;  %s2105_s23 = smov 96   ;;  %s2106_s27 = smov 80   ;;  %vm750_vm4 = vcmask 64512  }
  0x34   : > { %1857 = vmatpush3.bf16.msra.mxu0 %v2012_v2  ;;  %1860 = vmatprep.mubr.msk.bf16.mxu0 %vm2103_vm2, %v2102_v3  ;;  %v682_v7 = vpack.c.bf16 %v2292_v6, %v2290_v5  ;;  %v1787_v8 = vld [vmem:[%s2530_s16] ss:$0 sm:$0xff]  ;;  %s2107_s25 = smov 88   ;;  %s2108_s26 = smov 72   ;;  %vm798_vm5 = vcmask 89088   ;;  %vm802_vm6 = vcmask 83968  }
  0x35   : > { %1858 = vmatprep.subr.bf16.mxu0 %v2102_v3  ;;  %1866 = vmatprep.mubr.msk.bf16.mxu1 %vm2103_vm2, %v2102_v3  ;;  %s2109_s20 = smov 112   ;;  %s2110_s18 = smov 104   ;;  %vm824_vm7 = vcmask 1044480   ;;  %vm825_vm8 = vcmask 1045504   ;;  %v2115_v58 = vmov 65535   ;;  %vm1271_vm9 = vcmask 130048  }
  0x36   : > { %s2111_s21 = smov 56   ;;  %s2112_s22 = smov 64   ;;  %v826_v59 = vsel %vm824_vm7, 4294967295, %v2115_v58  ;;  %vm1274_vm10 = vcmask 195584   ;;  %vm1345_vm11 = vcmask 256000   ;;  %vm1484_vm12 = vcmask 523264  }
  0x37   : > { %s2113_s30 = smov 48   ;;  %s2114_s3 = smov 40   ;;  %v827_v62 = vsel %vm825_vm8, %v826_v59, 0 }
  0x38   : > { %1859 = vmatpush3.bf16.msra.mxu0 %v2013_v4  ;;  %s2531_s14 = sld [smem:[#allocation9_spill]]  ;;  %s2116_s5 = smov 8  }
  0x39   : > { %1870 = vmatprep.subr.bf16.mxu0 %v2102_v3  ;;  %s2117_s7 = smov 16   ;;  %s2118_s16 = smov 24  }
  0x3b   : > { %1861 = vmatmul.mubr.msk.bf16.vlgmr.msra.gmra.mrb[0].mxu0 %vm701_vm3, %v682_v7 }
  0x3c   : > { %1872 = vmatprep.mubr.msk.bf16.mxu0 %vm2103_vm2, %v2102_v3 }
 0x10e   : > { %v739_v9 = vpop.f32.mrb[0].mxu0 }
 0x10f   : > { %v1862_v10 = vpop.f32.mrb[1].mxu0  ;;  %v740_v12 = vadd.f32 %v1787_v8, %v739_v9 }
 0x110   : > { %v742_v11 = vpop.f32.mrb[2].mxu0 }
 0x111   : > { %v743_v13 = vadd.f32 %v1787_v8, %v742_v11  ;;  %v1863_v14 = vpop.f32.mrb[3].mxu0 }
 0x113   : > { %v2308_v15 = vpack.c.bf16 %v743_v13, %v740_v12 }
 0x115   : > { %876 = vrot.lane.b32.xlu1 %v2308_v15, %s2104_s19  ;;  %748 = vrot.lane.b32.xlu0 %v2308_v15, %s2105_s23 }
 0x119   : > { %1001 = vrot.lane.b32.xlu1 %v2308_v15, %s2106_s27  ;;  %878 = vrot.lane.b32.xlu0 %v2308_v15, %s2107_s25  ;;  %s2532_s27 = scalar_lea.vmem %s2495_s4, %s2223_s15 }
 0x11d   : > { %1124 = vrot.lane.b32.xlu1 %v2308_v15, %s2108_s26  ;;  %999 = vrot.lane.b32.xlu0 %v2308_v15, %s2109_s20 }
 0x121   : > { %1122 = vrot.lane.b32.xlu0 %v2308_v15, %s2110_s18 }
 0x187   : > { %v749_v16 = vpop.permute.xlu0 %748  ;;  %v877_v19 = vpop.permute.xlu1 %876 }
 0x188   : > { %v755_v17 = vsel %vm750_vm4, %v749_v16, 0 }
 0x189   : > { %1865 = vmatpush3.bf16.xpose.msra.mxu1 %v755_v17 }
 0x18a   : > { %1876 = vmatprep.subr.bf16.mxu1 %v2102_v3 }
 0x18b   : > { %v879_v18 = vpop.permute.xlu0 %878  ;;  %v1002_v21 = vpop.permute.xlu1 %1001 }
 0x18c   : > { %v884_v20 = vsel %vm750_vm4, %v879_v18, 0  ;;  %v1007_v22 = vsel %vm750_vm4, %v1002_v21, 0 }
 0x18f   : > { %v1125_v23 = vpop.permute.xlu1 %1124  ;;  %v1000_v24 = vpop.permute.xlu0 %999 }
 0x190   : > { %1867 = vmatmul.mubr.msk.bf16.vlgmr.msra.gmra.mrb[0].mxu1 %vm750_vm4, %v2308_v15  ;;  %v1130_v25 = vsel %vm750_vm4, %v1125_v23, 0 }
 0x191   : > { %1877 = vmatpush3.bf16.xpose.msra.mxu1 %v884_v20  ;;  %1878 = vmatprep.mubr.msk.bf16.mxu1 %vm2103_vm2, %v2102_v3 }
 0x192   : > { %1888 = vmatprep.subr.bf16.mxu1 %v2102_v3 }
 0x193   : > { %v1123_v26 = vpop.permute.xlu0 %1122 }
 0x198   : > { %1879 = vmatmul.mubr.msk.bf16.vlgmr.msra.gmra.mrb[4].mxu1 %vm750_vm4, %v877_v19 }
 0x199   : > { %1889 = vmatpush3.bf16.xpose.msra.mxu1 %v1007_v22  ;;  %1890 = vmatprep.mubr.msk.bf16.mxu1 %vm2103_vm2, %v2102_v3 }
 0x19a   : > { %1900 = vmatprep.subr.bf16.mxu1 %v2102_v3 }
 0x1a0   : > { %1891 = vmatmul.mubr.msk.bf16.vlgmr.msra.gmra.mrb[8].mxu1 %vm750_vm4, %v1000_v24 }
 0x1a1   : > { %1901 = vmatpush3.bf16.xpose.msra.mxu1 %v1130_v25  ;;  %1902 = vmatprep.mubr.msk.bf16.mxu1 %vm2103_vm2, %v2102_v3 }
 0x1a2   : > { %1912 = vmatprep.subr.bf16.mxu1 %v2102_v3 }
 0x1a8   : > { %1903 = vmatmul.mubr.msk.bf16.vlgmr.msra.gmra.mrb[12].mxu1 %vm750_vm4, %v1123_v26 }
 0x1a9   : > { %1916 = vmatprep.mubr.msk.bf16.mxu1 %vm2103_vm2, %v2102_v3 }
 0x263   : > { %v791_v27 = vpop.f32.mrb[0].mxu1 }
 0x264   : > { %v1868_v28 = vpop.f32.mrb[1].mxu1  ;;  %v799_v29 = vsel %vm798_vm5, %v791_v27, -inf }
 0x265   : > { %800 = vmax.xlane.f32.xlu1 %v799_v29  ;;  %v794_v30 = vpop.f32.mrb[2].mxu1 }
 0x266   : > { %v1869_v31 = vpop.f32.mrb[3].mxu1  ;;  %v803_v32 = vsel %vm802_vm6, %v794_v30, -inf }
 0x267   : > { %804 = vmax.xlane.f32.xlu0 %v803_v32 }
 0x26b   : > { %v920_v33 = vpop.f32.mrb[4].mxu1 }
 0x26c   : > { %v1880_v34 = vpop.f32.mrb[5].mxu1  ;;  %v927_v35 = vsel %vm798_vm5, %v920_v33, -inf }
 0x26d   : > { %928 = vmax.xlane.f32.xlu0 %v927_v35  ;;  %v2341_v36 = vpop.f32.mrb[6].mxu1 }
 0x26e   : > { %v1881_v37 = vpop.f32.mrb[7].mxu1  ;;  %v930_v46 = vsel %vm802_vm6, %v2341_v36, -inf }
 0x273   : > { %v2343_v38 = vpop.f32.mrb[8].mxu1 }
 0x274   : > { %v1892_v39 = vpop.f32.mrb[9].mxu1  ;;  %v1050_v48 = vsel %vm798_vm5, %v2343_v38, -inf }
 0x275   : > { %v2345_v40 = vpop.f32.mrb[10].mxu1 }
 0x276   : > { %946 = vrot.lane.b32.xlu1 %v2308_v15, %s2111_s21  ;;  %v1893_v41 = vpop.f32.mrb[11].mxu1  ;;  %v1053_v47 = vsel %vm802_vm6, %v2345_v40, -inf  ;;  %s2533_s21 = scalar_lea.vmem %s2497_s6, %s2223_s15 }
 0x27b   : > { %v2348_v42 = vpop.f32.mrb[12].mxu1 }
 0x27c   : > { %v1904_v43 = vpop.f32.mrb[13].mxu1  ;;  %v1173_v50 = vsel %vm798_vm5, %v2348_v42, -inf }
 0x27d   : > { %v2350_v44 = vpop.f32.mrb[14].mxu1 }
 0x27e   : > { %v1905_v45 = vpop.f32.mrb[15].mxu1  ;;  %v1176_v49 = vsel %vm802_vm6, %v2350_v44, -inf }
 0x283   : > { %819 = vrot.lane.b32.xlu0 %v2308_v15, %s2112_s22 }
 0x29a   : > { %931 = vmax.xlane.f32.xlu1 %v930_v46 }
 0x29e   : > { %1054 = vmax.xlane.f32.xlu1 %v1053_v47 }
 0x2a2   : > { %1051 = vmax.xlane.f32.xlu0 %v1050_v48  ;;  %1177 = vmax.xlane.f32.xlu1 %v1176_v49 }
 0x2a6   : > { %1174 = vmax.xlane.f32.xlu0 %v1173_v50 }
 0x2b3   : > { %1069 = vrot.lane.b32.xlu1 %v2308_v15, %s2113_s30 }
 0x2bc   : > { %1192 = vrot.lane.b32.xlu0 %v2308_v15, %s2114_s3 }
 0x2f2   : > { %v801_v51 = vpop.xlane.xlu1 %800 }
 0x2f3   : > { %v806_v52 = vsub.f32 %v791_v27, %v801_v51 }
 0x2f4   : > { %v805_v53 = vpop.xlane.xlu0 %804 }
 0x2f5   : > { %v808_v54 = vmul.f32 1.442695, %v806_v52  ;;  %v807_v55 = vsub.f32 %v794_v30, %v805_v53 }
 0x2f6   : > { %v947_v2 = vpop.permute.xlu1 %946 }
 0x2f7   : > { %v810_v56 = vmul.f32 1.442695, %v807_v55  ;;  %2022 = vpow2.f32 %v808_v54  ;;  %v952_v8 = vand.u32 %v947_v2, %v827_v62 }
 0x2f9   : > { %2024 = vpow2.f32 %v810_v56 }
 0x2fa   : > { %v929_v57 = vpop.xlane.xlu0 %928 }
 0x2fb   : > { %v933_v60 = vsub.f32 %v920_v33, %v929_v57 }
 0x2fd   : > { %v935_v61 = vmul.f32 1.442695, %v933_v60 }
 0x2fe   : > { %v820_v63 = vpop.permute.xlu0 %819 }
 0x2ff   : > { %2026 = vpow2.f32 %v935_v61  ;;  %v829_v0 = vand.u32 %v827_v62, %v820_v63  ;;  %v2014_v63 = vld [vmem:[%s2531_s14] sm:$0xff]  }
 0x300   : > { %1913 = vmatpush3.bf16.msra.mxu1 %v2014_v63 }
 0x301   : > { %1871 = vmatpush3.bf16.msra.mxu0 %v829_v0  ;;  %v2365_v1 = vpop.eup %2022  ;;  %1914 = vmatprep.subr.bf16.mxu1 %v2102_v3 }
 0x302   : > { %1882 = vmatprep.subr.bf16.mxu0 %v2102_v3 }
 0x303   : > { %v2025_v4 = vpop.eup %2024 }
 0x304   : > { %v818_v7 = vpack.c.bf16 %v2025_v4, %v2365_v1  ;;  %v815_v41 = vsel %vm802_vm6, %v2025_v4, 0.0 }
 0x306   : > { %1873 = vmatmul.mubr.msk.bf16.vlgmr.msra.gmra.mrb[4].mxu0 %vm798_vm5, %v818_v7 }
 0x307   : > { %1883 = vmatpush3.bf16.msra.mxu0 %v952_v8  ;;  %1884 = vmatprep.mubr.msk.bf16.mxu0 %vm2103_vm2, %v2102_v3 }
 0x308   : > { %1894 = vmatprep.subr.bf16.mxu0 %v2102_v3 }
 0x309   : > { %v2027_v9 = vpop.eup %2026 }
 0x30a   : > { %v939_v10 = vsel %vm798_vm5, %v2027_v9, 0.0 }
 0x30b   : > { %940 = vadd.xlane.f32.xlu1 %v939_v10 }
 0x327   : > { %v932_v11 = vpop.xlane.xlu1 %931 }
 0x328   : > { %v934_v12 = vsub.f32 %v2341_v36, %v932_v11 }
 0x32a   : > { %v937_v13 = vmul.f32 1.442695, %v934_v12  ;;  %v2015_v12 = vld [vmem:[%s2531_s14 + $0x8] sm:$0xff]  }
 0x32b   : > { %v1055_v14 = vpop.xlane.xlu1 %1054  ;;  %1915 = vmatpush3.bf16.msra.mxu1 %v2015_v12 }
 0x32c   : > { %2028 = vpow2.f32 %v937_v13  ;;  %v1057_v15 = vsub.f32 %v2345_v40, %v1055_v14  ;;  %1928 = vmatprep.subr.bf16.mxu1 %v2102_v3 }
 0x32e   : > { %v1060_v16 = vmul.f32 1.442695, %v1057_v15 }
 0x32f   : > { %v1178_v17 = vpop.xlane.xlu1 %1177  ;;  %v1052_v18 = vpop.xlane.xlu0 %1051 }
 0x330   : > { %2030 = vpow2.f32 %v1060_v16  ;;  %v1180_v19 = vsub.f32 %v2350_v44, %v1178_v17  ;;  %v1056_v20 = vsub.f32 %v2343_v38, %v1052_v18  ;;  %v812_v44 = vsel %vm798_vm5, %v2365_v1, 0.0 }
 0x332   : > { %v1183_v21 = vmul.f32 1.442695, %v1180_v19  ;;  %v1058_v22 = vmul.f32 1.442695, %v1056_v20 }
 0x333   : > { %v1175_v23 = vpop.xlane.xlu0 %1174  ;;  %v1070_v25 = vpop.permute.xlu1 %1069 }
 0x334   : > { %2032 = vpow2.f32 %v1183_v21  ;;  %v1179_v24 = vsub.f32 %v2348_v42, %v1175_v23  ;;  %v1075_v30 = vand.u32 %v1070_v25, %v827_v62 }
 0x335   : > { %2034 = vpow2.f32 %v1058_v22 }
 0x336   : > { %v2029_v26 = vpop.eup %2028  ;;  %v1181_v27 = vmul.f32 1.442695, %v1179_v24 }
 0x337   : > { %v942_v28 = vsel %vm802_vm6, %v2029_v26, 0.0  ;;  %v945_v29 = vpack.c.bf16 %v2029_v26, %v2027_v9  ;;  %v1193_v34 = vpop.permute.xlu0 %1192 }
 0x338   : > { %2036 = vpow2.f32 %v1181_v27  ;;  %943 = vadd.xlane.f32.xlu0 %v942_v28  ;;  %v1198_v39 = vand.u32 %v1193_v34, %v827_v62 }
 0x339   : > { %1885 = vmatmul.mubr.msk.bf16.vlgmr.msra.gmra.mrb[8].mxu0 %vm798_vm5, %v945_v29 }
 0x33a   : > { %v2031_v31 = vpop.eup %2030  ;;  %1895 = vmatpush3.bf16.msra.mxu0 %v1075_v30  ;;  %1896 = vmatprep.mubr.msk.bf16.mxu0 %vm2103_vm2, %v2102_v3 }
 0x33b   : > { %v1065_v32 = vsel %vm802_vm6, %v2031_v31, 0.0  ;;  %1906 = vmatprep.subr.bf16.mxu0 %v2102_v3 }
 0x33c   : > { %1066 = vadd.xlane.f32.xlu1 %v1065_v32 }
 0x33e   : > { %v2033_v33 = vpop.eup %2032 }
 0x33f   : > { %v2035_v35 = vpop.eup %2034  ;;  %v1188_v36 = vsel %vm802_vm6, %v2033_v33, 0.0 }
 0x340   : > { %1189 = vadd.xlane.f32.xlu1 %v1188_v36  ;;  %v1062_v37 = vsel %vm798_vm5, %v2035_v35, 0.0  ;;  %v1068_v38 = vpack.c.bf16 %v2031_v31, %v2035_v35 }
 0x341   : > { %1063 = vadd.xlane.f32.xlu0 %v1062_v37 }
 0x342   : > { %v2037_v40 = vpop.eup %2036  ;;  %1897 = vmatmul.mubr.msk.bf16.vlgmr.msra.gmra.mrb[12].mxu0 %vm798_vm5, %v1068_v38 }
 0x343   : > { %1907 = vmatpush3.bf16.msra.mxu0 %v1198_v39  ;;  %v1185_v42 = vsel %vm798_vm5, %v2037_v40, 0.0  ;;  %1908 = vmatprep.mubr.msk.bf16.mxu0 %vm2103_vm2, %v2102_v3  ;;  %v1191_v43 = vpack.c.bf16 %v2033_v33, %v2037_v40 }
 0x344   : > { %816 = vadd.xlane.f32.xlu1 %v815_v41  ;;  %1920 = vmatprep.subr.bf16.mxu0 %v2102_v3 }
 0x345   : > { %1186 = vadd.xlane.f32.xlu0 %v1185_v42 }
 0x349   : > { %813 = vadd.xlane.f32.xlu0 %v812_v44 }
 0x34a   : > { %1909 = vmatmul.mubr.msk.bf16.vlgmr.msra.gmra.mrb[16].mxu0 %vm798_vm5, %v1191_v43 }
 0x34b   : > { %1924 = vmatprep.mubr.msk.bf16.mxu0 %vm2103_vm2, %v2102_v3 }
 0x398   : > { %v941_v49 = vpop.xlane.xlu1 %940 }
 0x399   : > { %2038 = vrcp.f32 %v941_v49 }
 0x3a3   : > { %v2039_v54 = vpop.eup %2038 }
 0x3c5   : > { %v944_v50 = vpop.xlane.xlu0 %943 }
 0x3c6   : > { %2040 = vrcp.f32 %v944_v50 }
 0x3c9   : > { %v1067_v51 = vpop.xlane.xlu1 %1066 }
 0x3ca   : > { %2042 = vrcp.f32 %v1067_v51 }
 0x3cd   : > { %v1190_v61 = vpop.xlane.xlu1 %1189 }
 0x3ce   : > { %v1064_v52 = vpop.xlane.xlu0 %1063 }
 0x3cf   : > { %2044 = vrcp.f32 %v1064_v52 }
 0x3d0   : > { %v2041_v56 = vpop.eup %2040  ;;  %2046 = vrcp.f32 %v1190_v61 }
 0x3d1   : > { %v817_v23 = vpop.xlane.xlu1 %816 }
 0x3d2   : > { %v1187_v0 = vpop.xlane.xlu0 %1186 }
 0x3d3   : > { %2048 = vrcp.f32 %v1187_v0  ;;  %v2016_v0 = vld [vmem:[%s2248_s0] sm:$0xff]  }
 0x3d4   : > { %v2043_v2 = vpop.eup %2042  ;;  %2050 = vrcp.f32 %v817_v23  ;;  %1921 = vmatpush3.bf16.msra.mxu0 %v2016_v0  ;;  %v1816_v0 = vld [vmem:[%s639_s24] ss:$0 sm:$0xff] }
 0x3d5   : > { %1922 = vmatprep.subr.bf16.mxu0 %v2102_v3 }
 0x3d6   : > { %v814_v24 = vpop.xlane.xlu0 %813 }
 0x3d7   : > { %2052 = vrcp.f32 %v814_v24  ;;  %v2020_v24 = vld [vmem:[%s2262_s29 + $0x10] sm:$0xff]  }
 0x3d9   : > { %v2398_v45 = vpop.f32.mrb[4].mxu0  ;;  %v2045_v7 = vpop.eup %2044 }
 0x3da   : > { %v1874_v46 = vpop.f32.mrb[5].mxu0  ;;  %v2047_v15 = vpop.eup %2046 }
 0x3db   : > { %v2400_v47 = vpop.f32.mrb[6].mxu0 }
 0x3dc   : > { %v1875_v48 = vpop.f32.mrb[7].mxu0 }
 0x3dd   : > { %v2049_v17 = vpop.eup %2048 }
 0x3de   : > { %v2051_v26 = vpop.eup %2050 }
 0x3df   : > { %v875_v34 = vmul.f32 %v2051_v26, %v2400_v47  ;;  %v1805_v26 = vld [vmem:[%s2533_s21] ss:$0 sm:$0xff] }
 0x3e1   : > { %v2053_v28 = vpop.eup %2052 }
 0x3e2   : > { %v873_v33 = vmul.f32 %v2053_v28, %v2398_v45  ;;  %v1799_v45 = vld [vmem:[%s2532_s27] ss:$0 sm:$0xff] }
 0x40c   : > { %v988_v53 = vpop.f32.mrb[8].mxu0 }
 0x40d   : > { %v1886_v55 = vpop.f32.mrb[9].mxu0  ;;  %v996_v58 = vmul.f32 %v2039_v54, %v988_v53 }
 0x40e   : > { %v991_v57 = vpop.f32.mrb[10].mxu0 }
 0x40f   : > { %v998_v59 = vmul.f32 %v2041_v56, %v991_v57  ;;  %v1887_v60 = vpop.f32.mrb[11].mxu0 }
 0x411   : > { %v1997_v62 = vpack.i.bf16 %v998_v59, %v996_v58 }
 0x413   : > { %1998 = vrot.lane.b32.xlu0 %v1997_v62, %s2116_s5 }
 0x415   : > { %v1111_v1 = vpop.f32.mrb[12].mxu0 }
 0x416   : > { %v1898_v4 = vpop.f32.mrb[13].mxu0  ;;  %v1119_v9 = vmul.f32 %v2045_v7, %v1111_v1  ;;  %v2017_v1 = vld [vmem:[%s2248_s0 + $0x8] sm:$0xff]  }
 0x417   : > { %v1114_v8 = vpop.f32.mrb[14].mxu0  ;;  %1923 = vmatpush3.bf16.msra.mxu0 %v2017_v1  ;;  %v2019_v4 = vld [vmem:[%s2262_s29 + $0x8] sm:$0xff]  }
 0x418   : > { %v1121_v10 = vmul.f32 %v2043_v2, %v1114_v8  ;;  %v1899_v11 = vpop.f32.mrb[15].mxu0  ;;  %v2018_v2 = vld [vmem:[%s2262_s29] sm:$0xff]  }
 0x41a   : > { %v2002_v13 = vpack.i.bf16 %v1121_v10, %v1119_v9 }
 0x41c   : > { %2003 = vrot.lane.b32.xlu1 %v2002_v13, %s2117_s7  ;;  %s2535_s7 = sld [smem:[#allocation3_spill]] }
 0x41d   : > { %v1234_v14 = vpop.f32.mrb[16].mxu0 }
 0x41e   : > { %v1910_v16 = vpop.f32.mrb[17].mxu0  ;;  %v1242_v19 = vmul.f32 %v2049_v17, %v1234_v14 }
 0x41f   : > { %v1237_v18 = vpop.f32.mrb[18].mxu0 }
 0x420   : > { %v1244_v20 = vmul.f32 %v2047_v15, %v1237_v18  ;;  %v1911_v21 = vpop.f32.mrb[19].mxu0  ;;  %v1803_v15 = vld [vmem:[%s630_s17] ss:$0 sm:$0xff] }
 0x422   : > { %v2007_v22 = vpack.i.bf16 %v1244_v20, %v1242_v19  ;;  %v1804_v19 = vld [vmem:[%s633_s13] ss:$0 sm:$0xff]  ;;  %p1817_p8 = scmp.ne.s32.totalorder %s2535_s7, 1 }
 0x424   : > { %2008 = vrot.lane.b32.xlu1 %v2007_v22, %s2118_s16 }
 0x485   : > { %v1999_v25 = vpop.permute.xlu0 %1998 }
 0x486   : > { %v2001_v29 = vunpack.i.h.bf16 %v1999_v25  ;;  %v2000_v30 = vunpack.i.l.bf16 %v1999_v25  ;;  %v2021_v25 = vld [vmem:[%s2262_s29 + $0x18] sm:$0xff]   ;;  %s2534_s29 = scalar_lea.vmem %s2499_s8, %s2223_s15 }
 0x488   : > { %v1270_v36 = vsel %vm750_vm4, %v875_v34, %v2001_v29  ;;  %v1269_v37 = vsel %vm750_vm4, %v873_v33, %v2000_v30 }
 0x48e   : > { %v2004_v27 = vpop.permute.xlu1 %2003 }
 0x48f   : > { %v2006_v31 = vunpack.i.h.bf16 %v2004_v27  ;;  %v2005_v32 = vunpack.i.l.bf16 %v2004_v27 }
 0x491   : > { %v1273_v40 = vsel %vm1271_vm9, %v1270_v36, %v2006_v31  ;;  %v1272_v41 = vsel %vm1271_vm9, %v1269_v37, %v2005_v32 }
 0x496   : > { %v2009_v35 = vpop.permute.xlu1 %2008 }
 0x497   : > { %v2011_v38 = vunpack.i.h.bf16 %v2009_v35  ;;  %v2010_v39 = vunpack.i.l.bf16 %v2009_v35 }
 0x499   : > { %v1276_v42 = vsel %vm1274_vm10, %v1273_v40, %v2011_v38  ;;  %v1275_v43 = vsel %vm1274_vm10, %v1272_v41, %v2010_v39 }
 0x49a   : > { %v1277_v44 = vpack.c.bf16 %v1276_v42, %v1275_v43 }
 0x49c   : > { %1917 = vmatmul.mubr.msk.bf16.vlgmr.msra.gmra.mrb[16].mxu1 %vm701_vm3, %v1277_v44 }
 0x49d   : > { %1936 = vmatprep.mubr.msk.bf16.mxu1 %vm2103_vm2, %v2102_v3  ;;  %1929 = vmatpush3.bf16.msra.mxu1 %v2018_v2 }
 0x49e   : > { %1930 = vmatprep.subr.bf16.mxu1 %v2102_v3 }
 0x4a1   : > { %1931 = vmatpush3.bf16.msra.mxu1 %v2019_v4 }
 0x4a2   : > { %1932 = vmatprep.subr.bf16.mxu1 %v2102_v3 }
 0x4a5   : > { %1933 = vmatpush3.bf16.msra.mxu1 %v2020_v24 }
 0x4a6   : > { %1934 = vmatprep.subr.bf16.mxu1 %v2102_v3  ;;  %v1809_v3 = vld [vmem:[%s2534_s29] ss:$0 sm:$0xff] }
 0x4a9   : > { %1935 = vmatpush3.bf16.msra.mxu1 %v2021_v25 }
 0x56f   : > { %v1333_v46 = vpop.f32.mrb[16].mxu1 }
 0x570   : > { %v1334_v47 = vadd.f32 %v1799_v45, %v1333_v46  ;;  %v1918_v48 = vpop.f32.mrb[17].mxu1 }
 0x571   : > { %v1336_v49 = vpop.f32.mrb[18].mxu1 }
 0x572   : > { %v1337_v50 = vadd.f32 %v1799_v45, %v1336_v49  ;;  %v1919_v51 = vpop.f32.mrb[19].mxu1  ;;  %v1340_v52 = vadd.f32 %v1334_v47, %v2290_v5 }
 0x574   : > { %v1342_v53 = vsel %vm701_vm3, %v1340_v52, 0.0  ;;  %v1341_v54 = vadd.f32 %v1337_v50, %v2292_v6 }
 0x575   : > { %1343 = vadd.xlane.f32.xlu0 %v1342_v53 }
 0x576   : > { %v1346_v55 = vsel %vm1345_vm11, %v1341_v54, 0.0 }
 0x577   : > { %1347 = vadd.xlane.f32.xlu1 %v1346_v55 }
 0x602   : > { %v1344_v56 = vpop.xlane.xlu0 %1343 }
 0x603   : > { %v1350_v57 = vmul.f32 0.03125, %v1344_v56 }
 0x604   : > { %v1348_v58 = vpop.xlane.xlu1 %1347 }
 0x605   : > { %v1352_v59 = vsub.f32 %v1340_v52, %v1350_v57  ;;  %v1351_v60 = vmul.f32 0.03125, %v1348_v58 }
 0x607   : > { %v1353_v61 = vsub.f32 %v1341_v54, %v1351_v60  ;;  %v1354_v5 = vmul.f32 %v1352_v59, %v1352_v59 }
 0x609   : > { %v1356_v62 = vsel %vm701_vm3, %v1354_v5, 0.0  ;;  %v1355_v63 = vmul.f32 %v1353_v61, %v1353_v61 }
 0x60a   : > { %1357 = vadd.xlane.f32.xlu0 %v1356_v62  ;;  %v1815_v62 = vld [vmem:[%s636_s1] ss:$0 sm:$0xff] }
 0x60b   : > { %v1359_v6 = vsel %vm1345_vm11, %v1355_v63, 0.0 }
 0x60e   : > { %1360 = vadd.xlane.f32.xlu0 %v1359_v6 }
 0x697   : > { %v1358_v7 = vpop.xlane.xlu0 %1357 }
 0x698   : > { %v1362_v8 = vmul.f32 0.03125, %v1358_v7 }
 0x69a   : > { %v1364_v9 = vadd.f32 1e-05, %v1362_v8 }
 0x69b   : > { %v1361_v10 = vpop.xlane.xlu0 %1360 }
 0x69c   : > { %2054 = vrsqrt.f32 %v1364_v9  ;;  %v1363_v11 = vmul.f32 0.03125, %v1361_v10 }
 0x69e   : > { %v1365_v12 = vadd.f32 1e-05, %v1363_v11 }
 0x6a0   : > { %2056 = vrsqrt.f32 %v1365_v12 }
 0x6a6   : > { %v2055_v13 = vpop.eup %2054 }
 0x6a7   : > { %v1368_v14 = vmul.f32 %v2055_v13, %v1352_v59 }
 0x6a9   : > { %v1377_v17 = vmul.f32 %v1803_v15, %v1368_v14 }
 0x6aa   : > { %v2057_v16 = vpop.eup %2056 }
 0x6ab   : > { %v1369_v18 = vmul.f32 %v2057_v16, %v1353_v61  ;;  %v1386_v21 = vadd.f32 %v1804_v19, %v1377_v17 }
 0x6ad   : > { %v1378_v20 = vmul.f32 %v1803_v15, %v1369_v18 }
 0x6af   : > { %v1387_v22 = vadd.f32 %v1804_v19, %v1378_v20 }
 0x6b1   : > { %v1388_v23 = vpack.c.bf16 %v1387_v22, %v1386_v21 }
 0x6b3   : > { %1925 = vmatmul.mubr.msk.bf16.vlgmr.msra.gmra.mrb[20].mxu0 %vm701_vm3, %v1388_v23 }
 0x786   : > { %v1444_v27 = vpop.f32.mrb[20].mxu0 }
 0x787   : > { %v1445_v28 = vadd.f32 %v1805_v26, %v1444_v27  ;;  %v1926_v29 = vpop.f32.mrb[21].mxu0 }
 0x788   : > { %v1447_v30 = vpop.f32.mrb[22].mxu0 }
 0x789   : > { %v1448_v31 = vadd.f32 %v1805_v26, %v1447_v30  ;;  %v1927_v32 = vpop.f32.mrb[23].mxu0  ;;  %v1451_v33 = vmax.f32 %v1445_v28, 0.0 }
 0x78b   : > { %v1452_v34 = vmax.f32 %v1448_v31, 0.0 }
 0x78d   : > { %v1453_v35 = vpack.c.bf16 %v1452_v34, %v1451_v33 }
 0x78f   : > { %1937 = vmatmul.mubr.msk.bf16.vlgmr.msra.gmra.mrb[20].mxu1 %vm1484_vm12, %v1453_v35 }
 0x862   : > { %v1522_v36 = vpop.f32.mrb[20].mxu1 }
 0x863   : > { %v1523_v37 = vadd.f32 %v1809_v3, %v1522_v36  ;;  %v1938_v38 = vpop.f32.mrb[21].mxu1 }
 0x864   : > { %v1525_v39 = vpop.f32.mrb[22].mxu1 }
 0x865   : > { %v1526_v40 = vadd.f32 %v1809_v3, %v1525_v39  ;;  %v1939_v41 = vpop.f32.mrb[23].mxu1  ;;  %v1529_v42 = vadd.f32 %v1523_v37, %v1386_v21 }
 0x867   : > { %v1531_v43 = vsel %vm701_vm3, %v1529_v42, 0.0  ;;  %v1530_v44 = vadd.f32 %v1526_v40, %v1387_v22 }
 0x868   : > { %1532 = vadd.xlane.f32.xlu1 %v1531_v43 }
 0x869   : > { %v1534_v45 = vsel %vm1345_vm11, %v1530_v44, 0.0 }
 0x86a   : > { %1535 = vadd.xlane.f32.xlu0 %v1534_v45 }
 0x8f5   : > { %v1533_v46 = vpop.xlane.xlu1 %1532 }
 0x8f6   : > { %v1537_v47 = vmul.f32 0.03125, %v1533_v46 }
 0x8f7   : > { %v1536_v48 = vpop.xlane.xlu0 %1535 }
 0x8f8   : > { %v1539_v49 = vsub.f32 %v1529_v42, %v1537_v47  ;;  %v1538_v50 = vmul.f32 0.03125, %v1536_v48 }
 0x8fa   : > { %v1540_v51 = vsub.f32 %v1530_v44, %v1538_v50  ;;  %v1541_v52 = vmul.f32 %v1539_v49, %v1539_v49 }
 0x8fc   : > { %v1543_v53 = vsel %vm701_vm3, %v1541_v52, 0.0  ;;  %v1542_v54 = vmul.f32 %v1540_v51, %v1540_v51 }
 0x8fd   : > { %1544 = vadd.xlane.f32.xlu1 %v1543_v53 }
 0x8fe   : > { %v1546_v55 = vsel %vm1345_vm11, %v1542_v54, 0.0 }
 0x8ff   : > { %1547 = vadd.xlane.f32.xlu0 %v1546_v55 }
 0x98a   : > { %v1545_v56 = vpop.xlane.xlu1 %1544 }
 0x98b   : > { %v1549_v57 = vmul.f32 0.03125, %v1545_v56 }
 0x98c   : > { %v1548_v58 = vpop.xlane.xlu0 %1547 }
 0x98d   : > { %v1551_v59 = vadd.f32 1e-05, %v1549_v57  ;;  %v1550_v60 = vmul.f32 0.03125, %v1548_v58 }
 0x98f   : > { %2058 = vrsqrt.f32 %v1551_v59  ;;  %v1552_v61 = vadd.f32 1e-05, %v1550_v60 }
 0x991   : > { %2060 = vrsqrt.f32 %v1552_v61 }
 0x999   : > { %v2059_v5 = vpop.eup %2058 }
 0x99a   : > { %v1555_v63 = vmul.f32 %v2059_v5, %v1539_v49 }
 0x99b   : > { %v2061_v6 = vpop.eup %2060 }
 0x99c   : > { %v1564_v1 = vmul.f32 %v1815_v62, %v1555_v63  ;;  %v1556_v2 = vmul.f32 %v2061_v6, %v1540_v51  ;;  %1580 = sbr.rel (%p1817_p8) target bundleno = 2467 (0x9a3), region = 80 }
 0x99e   : > { %v1573_v4 = vadd.f32 %v1816_v0, %v1564_v1  ;;  %v1565_v7 = vmul.f32 %v1815_v62, %v1556_v2 }
 0x9a0   : > { %1575 = vst.msk [vmem:[#allocation2] sm:$0xff] %vm701_vm3, %v1573_v4  ;;  %v1574_v8 = vadd.f32 %v1816_v0, %v1565_v7  ;;  %1581 = vst.msk [vmem:[%s2283_s28] sm:$0xff] (!%p1817_p8), %vm701_vm3, %v1573_v4 }
 0x9a2   : > { %1576 = vst.msk [vmem:[#allocation2 + $0x8] sm:$0x7] %vm1345_vm11, %v1574_v8  ;;  %1582 = vst.msk [vmem:[%s2283_s28 + $0x8] sm:$0x7] (!%p1817_p8), %vm1345_vm11, %v1574_v8 }
 0x9a3 PF: > { %s2536_s1 = sld [smem:[#allocation6_spill]]  ;;  %s2537_s25 = sld [smem:[#allocation4_spill]] }
 0x9a4   : > { %s2538_s26 = sld [smem:[#allocation5_spill]]  ;;  %s2539_s27 = sld [smem:[#allocation7_spill]] }
 0x9a5   : > { %s2540_s28 = sld [smem:[#allocation8_spill]] }
 0x9a9   : > { %s23_s29 = sadd.s32 1, %s2536_s1  }
 0x9aa   : > { %p20_p9 = scmp.ge.s32.totalorder %s23_s29, 6  }
 0x9ac   :  { %22 = sbr.rel (!%p20_p9) target bundleno = 7 (0x7), region = 146 }

</bundles_post_ra>
